<compile_context>
chip_gen: v6e
topology: v6e:2x2x1
jax: 0.10.0
libtpu: 0.0.40
codegen_flags: <defaults>
</compile_context>

<pallas_src>
import jax
import jax.numpy as jnp
from jax import lax
from jax.experimental import pallas as pl
from jax.experimental.pallas import tpu as pltpu


def _actor_kernel(b_ref, x_ref, w_ref, o_ref):
    # b_ref : SMEM (1,)       f32        -- conv bias (untiled, shared by all steps)
    # x_ref : VMEM (tm, F)    obs dtype  -- row-tile of obs (rows = merged N*H axis)
    # w_ref : VMEM (8, F)     obs dtype  -- conv filter, replicated over 8 sublanes
    # o_ref : VMEM (1, 1, tm) out dtype  -- lane-dense logits for this row-tile
    y = lax.dot_general(
        w_ref[...], x_ref[...],
        dimension_numbers=(((1,), (1,)), ((), ())),   # contract F with F (rhs transposed)
        preferred_element_type=jnp.float32,
    )                                                 # (8, tm) f32, rows identical
    row = y[0:1, :]                                   # (1, tm) -- sublane 0
    o_ref[...] = jnp.maximum(row + b_ref[0], 0.0).astype(o_ref.dtype)[None]


def actor_forward(obs_nchw, weight, bias, *, tile_m=8192):
    """obs_nchw: (N, 1, H, F); weight: (F,); bias: () -> (N, H) action logits."""
    N, C, H, F = obs_nchw.shape
    assert C == 1, "Actor's conv has a single input channel"
    M = N * H

    x = obs_nchw.reshape(M, F)                 # free reshape; dtype preserved (no upcast copy)
    out_dtype = x.dtype
    w8 = jnp.broadcast_to(jnp.asarray(weight, x.dtype).reshape(1, F), (8, F))
    b = jnp.asarray(bias, jnp.float32).reshape(1)

    # Row-tile size: as large as VMEM comfortably allows (8192 rows = 4 MiB f32
    # per buffer; double-buffered it stays under the v5e 16 MiB scoped default).
    # Keep the tile sublane-aligned; the cdiv grid handles the partial tail
    # block, so no wrapper-side padding copy is ever made.
    align = 16 if x.dtype == jnp.bfloat16 else 8
    tm = min(tile_m, M)
    if tm >= align:
        tm -= tm % align
    grid = pl.cdiv(M, tm)

    in_item = jnp.dtype(x.dtype).itemsize
    cost = pl.CostEstimate(
        flops=2 * M * F,
        transcendentals=0,
        bytes_accessed=M * F * in_item + M * jnp.dtype(out_dtype).itemsize + 8 * F * in_item,
    )

    out = pl.pallas_call(
        _actor_kernel,
        out_shape=jax.ShapeDtypeStruct((grid, 1, tm), out_dtype),
        grid=(grid,),
        in_specs=[
            pl.BlockSpec(memory_space=pltpu.SMEM),        # bias scalar, untiled
            pl.BlockSpec((tm, F), lambda i: (i, 0)),      # obs row-tile (double-buffered)
            pl.BlockSpec((8, F), lambda i: (0, 0)),       # filter, same block every step
        ],
        out_specs=pl.BlockSpec((1, 1, tm), lambda i: (i, 0, 0)),   # lane-dense logits
        compiler_params=pltpu.CompilerParams(
            dimension_semantics=("parallel",),            # shard row tiles across TCs (v7x)
        ),
        cost_estimate=cost,
    )(b, x, w8)

    return out.reshape(grid * tm)[:M].reshape(N, H)


def _reference_forward(obs_nchw, weight, bias):
    # Plain-JAX reference: conv([1,F]) + ReLU + Flatten == per-row dot + bias + relu.
    N, _, H, F = obs_nchw.shape
    x = obs_nchw.reshape(N, H, F).astype(jnp.float32)
    y = jnp.einsum("nhf,f->nh", x, weight.astype(jnp.float32)) + bias
    return jnp.maximum(y, 0.0)


if __name__ == "__main__":
    # Small shapes consistent with the module: feature_dim=128, action_dim(H)=8, batch=2.
    feature_dim = 128
    action_dim = 8   # H
    batch = 2        # N

    key = jax.random.PRNGKey(0)
    k_obs, k_w, k_b = jax.random.split(key, 3)

    # Conv2d(1,1,[1,feature_dim]) parameters: weight (1,1,1,F) -> (F,), bias (1,) -> scalar.
    bound = 1.0 / jnp.sqrt(float(feature_dim))  # PyTorch conv default uniform bound
    weight = jax.random.uniform(k_w, (feature_dim,), jnp.float32, -bound, bound)
    bias = jax.random.uniform(k_b, (), jnp.float32, -bound, bound)

    obs = jax.random.normal(k_obs, (batch, 1, action_dim, feature_dim), jnp.float32)

    logits = jax.block_until_ready(actor_forward(obs, weight, bias))
    ref = _reference_forward(obs, weight, bias)
    assert logits.shape == (batch, action_dim)
    assert jnp.allclose(logits, ref, atol=1e-5, rtol=1e-5), "mismatch vs reference"

    # Multi-tile + partial-tail path (M = 37*71 = 2627; tile 512 -> 6 tiles, tail of 67 rows).
    obs_big = jax.random.normal(jax.random.PRNGKey(1), (37, 1, 71, feature_dim), jnp.float32)
    ref_big = _reference_forward(obs_big, weight, bias)
    out_tiled = jax.block_until_ready(actor_forward(obs_big, weight, bias, tile_m=512))
    assert jnp.allclose(out_tiled, ref_big, atol=1e-4, rtol=1e-4), "mismatch (tiled path)"

    # Default large-tile path on the same input (single 2624-row tile + 3-row tail).
    out_default = jax.block_until_ready(actor_forward(obs_big, weight, bias))
    assert jnp.allclose(out_default, ref_big, atol=1e-4, rtol=1e-4), "mismatch (default tile)"

    # bf16 inputs stream without any wrapper upcast (half the HBM traffic), f32 accumulation.
    obs_bf16 = obs_big.astype(jnp.bfloat16)
    out_bf16 = jax.block_until_ready(actor_forward(obs_bf16, weight, bias, tile_m=1024))
    ref_bf16 = _reference_forward(obs_bf16, weight, bias)
    assert out_bf16.dtype == jnp.bfloat16
    assert jnp.allclose(out_bf16.astype(jnp.float32), ref_bf16, atol=5e-2, rtol=5e-2), \
        "mismatch (bf16 path)"

    print("KERNEL_OK")
</pallas_src>

<mosaic_0001>
module attributes {stable_mosaic.version = 11 : i64} {
  func.func @_actor_kernel(%arg0: i32, %arg1: memref<1xf32, #tpu.memory_space<smem>>, %arg2: memref<16x128xf32, #tpu.memory_space<vmem>>, %arg3: memref<8x128xf32, #tpu.memory_space<vmem>>, %arg4: memref<1x1x16xf32, #tpu.memory_space<vmem>>) attributes {dimension_semantics = [#tpu.dimension_semantics<parallel>], iteration_bounds = array<i64: 1>, scalar_prefetch = 0 : i64, scratch_operands = 0 : i64, tpu.core_type = #tpu.core_type<tc>, window_params = [{transform_indices = @transform_0, window_bounds = array<i64: 1>}, {transform_indices = @transform_1, window_bounds = array<i64: 16, 128>}, {pipeline_mode = #tpu.pipeline_mode<synchronous>, transform_indices = @transform_2, window_bounds = array<i64: 8, 128>}, {transform_indices = @transform_3, window_bounds = array<i64: 1, 1, 16>}]} {
    %c0 = arith.constant 0 : index
    %c0_0 = arith.constant 0 : index
    %0 = vector.load %arg3[%c0, %c0_0] : memref<8x128xf32, #tpu.memory_space<vmem>>, vector<8x128xf32>
    %c0_1 = arith.constant 0 : index
    %c0_2 = arith.constant 0 : index
    %1 = vector.load %arg2[%c0_1, %c0_2] : memref<16x128xf32, #tpu.memory_space<vmem>>, vector<16x128xf32>
    %cst = arith.constant dense<0.000000e+00> : vector<8x16xf32>
    %2 = tpu.matmul %0, %1, %cst {dimension_numbers = #tpu.dot_dimension_numbers<[1], [1], [0], [0], [0, 0, 1, 0], [], []>} : vector<8x128xf32>, vector<16x128xf32>, vector<8x16xf32> -> vector<8x16xf32>
    %3 = vector.extract_strided_slice %2 {offsets = [0, 0], sizes = [1, 16], strides = [1, 1]} : vector<8x16xf32> to vector<1x16xf32>
    %c0_3 = arith.constant 0 : index
    %4 = memref.load %arg1[%c0_3] : memref<1xf32, #tpu.memory_space<smem>>
    %5 = vector.broadcast %4 : f32 to vector<1x16xf32>
    %6 = arith.addf %3, %5 : vector<1x16xf32>
    %cst_4 = arith.constant 0.000000e+00 : f32
    %7 = vector.broadcast %cst_4 : f32 to vector<1x16xf32>
    %8 = arith.maximumf %6, %7 : vector<1x16xf32>
    %9 = vector.shape_cast %8 : vector<1x16xf32> to vector<1x1x16xf32>
    %c0_5 = arith.constant 0 : index
    %c0_6 = arith.constant 0 : index
    %c0_7 = arith.constant 0 : index
    %10 = vector.load %arg4[%c0_5, %c0_6, %c0_7] : memref<1x1x16xf32, #tpu.memory_space<vmem>>, vector<1x1x16xf32>
    tpu.vector_store %arg4[%c0_5, %c0_6, %c0_7], %9 {strides = array<i32>} : memref<1x1x16xf32, #tpu.memory_space<vmem>>, vector<1x1x16xf32>,
    return
  }
  func.func @transform_0(%arg0: i32) -> i32 {
    %c0_i32 = arith.constant 0 : i32
    %c0_i32_0 = arith.constant 0 : i32
    return %c0_i32 : i32
  }
  func.func @transform_1(%arg0: i32) -> (i32, i32) {
    %c0_i32 = arith.constant 0 : i32
    %c0_i32_0 = arith.constant 0 : i32
    return %arg0, %c0_i32 : i32, i32
  }
  func.func @transform_2(%arg0: i32) -> (i32, i32) {
    %c0_i32 = arith.constant 0 : i32
    %c0_i32_0 = arith.constant 0 : i32
    %c0_i32_1 = arith.constant 0 : i32
    return %c0_i32, %c0_i32_0 : i32, i32
  }
  func.func @transform_3(%arg0: i32) -> (i32, i32, i32) {
    %c0_i32 = arith.constant 0 : i32
    %c0_i32_0 = arith.constant 0 : i32
    %c0_i32_1 = arith.constant 0 : i32
    return %arg0, %c0_i32, %c0_i32_0 : i32, i32, i32
  }
}

</mosaic_0001>

<bundles_post_ra>
// kernel: tpu_custom_call.1
= control target key start
LH: loop header
LB: loop body
LE: loop exit
PB: predicated region body
PF: predicated region fallthrough
CT: control target
= control target key end

     0   :  { %9 = vsyncpa [#allocation4], 0  ;;  %s259_s0 = inlined_call_operand.<no memory space> [shape: f32[1], index: 0, kind: input, shape index: {}]   ;;  %s260_s1 = inlined_call_operand.hbm [shape: f32[16,128], index: 1, kind: input, shape index: {}]   ;;  %s261_s2 = inlined_call_operand.hbm [shape: f32[8,128], index: 2, kind: input, shape index: {}]   ;;  %s262_s3 = inlined_call_operand.hbm [shape: f32[1,1,16], index: 3, kind: output, shape index: {}]  }
   0x1   :  { %10 = vsyncpa [#allocation7], 0 }
   0x2   :  { %11 = vsyncpa [#allocation5], 0  ;;  %s220_s12 = smov [#allocation3]  }
   0x3   :  { %s19_s13 = sshll.u32 %s220_s12, 4  ;;  %s20_s13 = int_to_ptr.vmem [resolvable:$true] %s19_s13 }
   0x4   :  { %s162_s14 = scalar_lea.vmem %s20_s13, 256  ;;  %p167_p1 = scmp.lt.s32.totalorder %s20_s13, %s20_s13 }
   0x5   :  { %p163_p0 = scmp.ne.s32.totalorder %s20_s13, %s162_s14  ;;  %p168_p2 = scmp.lt.s32.totalorder %s162_s14, %s162_s14 }
   0x7   :  { %p169_p3 = por %p168_p2, %p167_p1 }
   0x9   :  { %p170_p4 = pnand %p169_p3, %p163_p0 }
   0xb   :  { %173 = shalt.err (!%p170_p4)
}
   0xc   :  { %s221_s15 = smov 128   ;;  %s222_s16 = smov 8  }
   0xd   :  { %25 = dma.hbm_to_vmem [thread:$0]  %s260_s1, 256, %s20_s13, [#allocation4], %s221_s15, %s221_s15, %s222_s16  }
   0xe   :  { %s223_s19 = smov [#allocation6]  }
   0xf   :  { %s32_s20 = sshll.u32 %s223_s19, 4  ;;  %s33_s20 = int_to_ptr.vmem [resolvable:$true] %s32_s20 }
  0x10   :  { %s182_s21 = scalar_lea.vmem %s33_s20, 128  ;;  %p187_p6 = scmp.lt.s32.totalorder %s33_s20, %s33_s20 }
  0x11   :  { %p183_p5 = scmp.ne.s32.totalorder %s33_s20, %s182_s21  ;;  %p188_p7 = scmp.lt.s32.totalorder %s182_s21, %s182_s21 }
  0x13   :  { %p189_p8 = por %p188_p7, %p187_p6 }
  0x15   :  { %p190_p9 = pnand %p189_p8, %p183_p5 }
  0x17   :  { %193 = shalt.err (!%p190_p9)
}
  0x18   :  { %35 = dma.hbm_to_vmem [thread:$0]  %s261_s2, 128, %s33_s20, [#allocation7]  }
  0x19   :  { %214 = dma.done.wait [#allocation4], 256  }
  0x1a   :  { %215 = vsyncadd [#allocation4], 4294967040 }
  0x1b   :  { %216 = dma.done.wait [#allocation7], 128  }
  0x1c   :  { %217 = vsyncadd [#allocation7], 4294967168  ;;  %v224_v0 = vmov 0.0   ;;  %vm225_vm0 = vmmov 0   ;;  %v44_v1 = vld [vmem:[#allocation3 + $0x8] sm:$0xff]  ;;  %v43_v2 = vld [vmem:[#allocation3] sm:$0xff]  ;;  %v116_v4 = vstv %s259_s0 }
  0x1d   :  { %140 = vmatprep.subr.mxu0 %v224_v0  ;;  %144 = vmatprep.mubr.msk.f32.mxu0 %vm225_vm0, %v224_v0  ;;  %v42_v3 = vld [vmem:[#allocation6] sm:$0xff]  ;;  %s226_s2 = smov [#allocation8]   ;;  %vm119_vm1 = vcmask 122880  }
  0x1e   :  { %141 = vmatpush3.xpose.msra.mxu0 %v44_v1  ;;  %s127_s25 = sshll.u32 %s226_s2, 4  ;;  %s128_s25 = int_to_ptr.vmem [resolvable:$true] %s127_s25 }
  0x1f   :  { %142 = vmatprep.subr.mxu0 %v224_v0  ;;  %s194_s26 = scalar_lea.vmem %s128_s25, 16  ;;  %s198_s27 = scalar_lea.vmem %s128_s25, 32 }
  0x20   :  { %p195_p10 = scmp.ne.s32.totalorder %s128_s25, %s194_s26  ;;  %p199_p11 = scmp.lt.s32.totalorder %s128_s25, %s128_s25 }
  0x21   :  { %p200_p12 = scmp.lt.s32.totalorder %s198_s27, %s194_s26 }
  0x22   :  { %143 = vmatpush3.xpose.msra.mxu0 %v43_v2 }
  0x23   :  { %p201_p13 = por %p200_p12, %p199_p11 }
  0x25   :  { %145 = vmatmul.mubr.f32.vlgmr.msra.gmra.mxu0 %v42_v3  ;;  %p202_p0 = pnand %p201_p13, %p195_p10 }
  0xe5   :  { %v111_v5 = vpop.f32.mrf.mxu0 }
  0xe6   :  { %v117_v6 = vadd.f32 %v116_v4, %v111_v5 }
  0xe7   :  { %v146_v7 = vpop.f32.mrf.mxu0 }
  0xe8   :  { %v118_v8 = vmax.f32 %v117_v6, 0.0 }
  0xea   :  { %120 = vst.msk [vmem:[#allocation8] sm:$0x1] %vm119_vm1, %v118_v8 }
  0xeb   :  { %205 = shalt.err (!%p202_p0)
}
  0xec   :  { %130 = dma.vmem_to_hbm [thread:$0]  %s128_s25, 16, %s262_s3, [#allocation5]  }
  0xed   :  { %218 = dma.done.wait [#allocation5], 16  }
  0xee   :  { %219 = vsyncadd [#allocation5], 4294967280 }
  0xef   :  { %134 = vsyncpa [#allocation4], 1 }
  0xf0   :  { %135 = vsyncpa [#allocation7], 1 }
  0xf1   :  { %136 = vsyncpa [#allocation5], 1 }

</bundles_post_ra>
